<compile_context>
chip_gen: v5e
topology: v5e:2x2
jax: 0.10.0
libtpu: 0.0.40
codegen_flags: <defaults>
</compile_context>

<pallas_src>
import functools

import jax
import jax.numpy as jnp
from jax import lax
from jax.experimental import pallas as pl
from jax.experimental.pallas import tpu as pltpu

EPS = 1e-5


def avgpool_construct_kernel(x_ref, g_ref, b_ref, out_ref, *,
                             cum_windows, seq_lens):
    # x_ref:   (Bb, L, D)        input block (VMEM)
    # g_ref:   (1, 1, D)         LayerNorm weight
    # b_ref:   (1, 1, D)         LayerNorm bias
    # out_ref: (Bb, total, D)    output block (VMEM)
    g = g_ref[...]
    b = b_ref[...]

    def layernorm_store(v, off, l_out):
        # v: (Bb, l_out, D) f32.  LayerNorm over D (biased var, eps=1e-5),
        # stored straight to the output slice (no staging scratch).
        mu = jnp.mean(v, axis=-1, keepdims=True)
        var = jnp.mean(jnp.square(v - mu), axis=-1, keepdims=True)
        y = (v - mu) * lax.rsqrt(var + EPS) * g + b
        out_ref[:, off:off + l_out, :] = y.astype(out_ref.dtype)

    # Stage 0: the original sequence — single dense read, LN, direct store.
    layernorm_store(x_ref[...].astype(jnp.float32), 0, seq_lens[0])

    # Pyramid stages.  k cascaded AvgPool1d(w_i, stride=w_i) layers equal one
    # non-overlapping average over W_k = w1*...*wk consecutive original
    # positions (truncation included), so each stage is computed directly from
    # the VMEM-resident input block with W_k strided sublane reads + adds.
    off = seq_lens[0]
    for W, l_out in zip(cum_windows, seq_lens[1:]):
        if l_out == 0:           # degenerate stage (sequence shorter than window)
            continue
        acc = x_ref[:, pl.ds(0, l_out, stride=W), :].astype(jnp.float32)
        for t in range(1, W):
            acc = acc + x_ref[:, pl.ds(t, l_out, stride=W), :].astype(jnp.float32)
        layernorm_store(acc * (1.0 / W), off, l_out)
        off += l_out


def _has_multiple_tensorcores():
    # Tuning heuristic only: v7x (2 TC/chip) and v4/v5p (megacore) share a
    # "parallel" grid axis across 2 cores; v5e/v6e have a single TensorCore,
    # where splitting small batches only adds per-step pipeline overhead.
    try:
        kind = jax.devices()[0].device_kind.lower()
    except Exception:
        return False
    return any(tag in kind for tag in ("v7", "v4", "v5p"))


def _pick_batch_block(B, L, total, D, itemsize, *, multi_tc,
                      budget_bytes=16 << 20, min_split_bytes=2 << 20):
    # Per-step working set = double-buffered input block + double-buffered
    # output block (this kernel has no VMEM scratch).  ~16 MiB per step keeps
    # the DMA engine streaming (measured: small tiles ~29% of HBM roofline,
    # large tiles ~85%) while staying well inside every generation's VMEM.
    per_batch = 2 * (L + total) * D * itemsize
    bb = max(1, budget_bytes // max(per_batch, 1))
    bb = min(bb, B)
    if multi_tc and B >= 2:
        # Split across the two TensorCores only when each half-step still
        # moves enough HBM (>~2 MiB) to amortize the ~0.35 us step overhead.
        half = -(-B // 2)
        if half * (L + total) * D * itemsize >= min_split_bytes:
            bb = min(bb, half)
    return int(bb)


def avg_pooling_construct(x, window_size, gamma, beta):
    """x: (B, L, D). Returns LayerNorm(concat(x, avgpool(x), avgpool^2, avgpool^3))."""
    B, L, D = x.shape
    if isinstance(window_size, (list, tuple)):
        windows = tuple(int(w) for w in window_size)
    else:
        windows = (int(window_size),) * 3
    assert len(windows) == 3

    seq_lens = [L]
    cum_windows = []
    W = 1
    for w in windows:
        W *= w
        cum_windows.append(W)
        seq_lens.append(seq_lens[-1] // w)   # AvgPool1d(kernel=w, stride=w)
    total = sum(seq_lens)

    itemsize = jnp.dtype(x.dtype).itemsize
    multi_tc = _has_multiple_tensorcores()
    Bb = _pick_batch_block(B, L, total, D, itemsize, multi_tc=multi_tc)

    # Non-divisor batch: pad to a multiple of Bb (keeps the budget-derived
    # block size) and slice the result back; padded rows are independent.
    num_steps = -(-B // Bb)
    Bpad = num_steps * Bb
    x_in = x if Bpad == B else jnp.pad(x, ((0, Bpad - B), (0, 0), (0, 0)))

    # Explicit scoped-VMEM budget: 2x input block + 2x output block + headroom.
    # Capped at 48 MiB (fits v7x's 64 MiB physical); raised explicitly so
    # v5e's 16 MiB scoped default never forces a fallback.
    block_bytes = Bb * 2 * (L + total) * D * itemsize
    vmem_limit = int(min(max(block_bytes + (4 << 20), 16 << 20), 48 << 20))
    vmem_limit = int(max(vmem_limit, block_bytes + (2 << 20)))

    g3 = gamma.reshape(1, 1, D).astype(jnp.float32)
    b3 = beta.reshape(1, 1, D).astype(jnp.float32)

    kernel = functools.partial(avgpool_construct_kernel,
                               cum_windows=tuple(cum_windows),
                               seq_lens=tuple(seq_lens))

    out = pl.pallas_call(
        kernel,
        out_shape=jax.ShapeDtypeStruct((Bpad, total, D), x.dtype),
        grid_spec=pltpu.PrefetchScalarGridSpec(
            num_scalar_prefetch=0,
            grid=(num_steps,),
            in_specs=[
                pl.BlockSpec((Bb, L, D), lambda i: (i, 0, 0)),   # x, Bb batches/step
                pl.BlockSpec((1, 1, D), lambda i: (0, 0, 0)),    # LN weight
                pl.BlockSpec((1, 1, D), lambda i: (0, 0, 0)),    # LN bias
            ],
            out_specs=pl.BlockSpec((Bb, total, D), lambda i: (i, 0, 0)),
        ),
        compiler_params=pltpu.CompilerParams(
            dimension_semantics=("parallel",),
            vmem_limit_bytes=vmem_limit),
    )(x_in, g3, b3)

    return out if Bpad == B else out[:B]


def _reference(x, windows, gamma, beta):
    if not isinstance(windows, (list, tuple)):
        windows = (windows,) * 3
    outs = [x]
    cur = x
    for w in windows:
        B, L, D = cur.shape
        lo = L // w
        cur = cur[:, : lo * w, :].reshape(B, lo, w, D).mean(axis=2)
        outs.append(cur)
    cat = jnp.concatenate(outs, axis=1)
    mu = cat.mean(-1, keepdims=True)
    var = ((cat - mu) ** 2).mean(-1, keepdims=True)
    return (cat - mu) / jnp.sqrt(var + EPS) * gamma + beta


if __name__ == "__main__":
    # Module hyperparams: d_model=32, window_size=2 (d_inner unused in forward).
    B, L, D = 2, 8, 32
    window_size = 2

    key = jax.random.PRNGKey(0)
    x = jax.random.normal(key, (B, L, D), dtype=jnp.float32)

    # nn.LayerNorm default init: weight=1, bias=0.
    gamma = jnp.ones((D,), dtype=jnp.float32)
    beta = jnp.zeros((D,), dtype=jnp.float32)

    out = avg_pooling_construct(x, window_size, gamma, beta)
    out = jax.block_until_ready(out)

    ref = _reference(x, window_size, gamma, beta)
    assert out.shape == ref.shape, (out.shape, ref.shape)
    assert jnp.allclose(out, ref, rtol=1e-4, atol=1e-4), float(jnp.abs(out - ref).max())

    print("KERNEL_OK")
</pallas_src>

<mosaic_0001>
module attributes {stable_mosaic.version = 11 : i64} {
  func.func @avgpool_construct_kernel(%arg0: i32, %arg1: memref<2x8x32xf32, #tpu.memory_space<vmem>>, %arg2: memref<1x1x32xf32, #tpu.memory_space<vmem>>, %arg3: memref<1x1x32xf32, #tpu.memory_space<vmem>>, %arg4: memref<2x15x32xf32, #tpu.memory_space<vmem>>) attributes {dimension_semantics = [#tpu.dimension_semantics<parallel>], iteration_bounds = array<i64: 1>, scalar_prefetch = 0 : i64, scratch_operands = 0 : i64, tpu.core_type = #tpu.core_type<tc>, window_params = [{transform_indices = @transform_0, window_bounds = array<i64: 2, 8, 32>}, {pipeline_mode = #tpu.pipeline_mode<synchronous>, transform_indices = @transform_1, window_bounds = array<i64: 1, 1, 32>}, {pipeline_mode = #tpu.pipeline_mode<synchronous>, transform_indices = @transform_2, window_bounds = array<i64: 1, 1, 32>}, {transform_indices = @transform_3, window_bounds = array<i64: 2, 15, 32>}]} {
    %c0 = arith.constant 0 : index
    %c0_0 = arith.constant 0 : index
    %c0_1 = arith.constant 0 : index
    %0 = vector.load %arg2[%c0, %c0_0, %c0_1] : memref<1x1x32xf32, #tpu.memory_space<vmem>>, vector<1x1x32xf32>
    %c0_2 = arith.constant 0 : index
    %c0_3 = arith.constant 0 : index
    %c0_4 = arith.constant 0 : index
    %1 = vector.load %arg3[%c0_2, %c0_3, %c0_4] : memref<1x1x32xf32, #tpu.memory_space<vmem>>, vector<1x1x32xf32>
    %c0_5 = arith.constant 0 : index
    %c0_6 = arith.constant 0 : index
    %c0_7 = arith.constant 0 : index
    %2 = vector.load %arg1[%c0_5, %c0_6, %c0_7] : memref<2x8x32xf32, #tpu.memory_space<vmem>>, vector<2x8x32xf32>
    %cst = arith.constant dense<0.000000e+00> : vector<2x8xf32>
    %3 = vector.multi_reduction <add>, %2, %cst [2] : vector<2x8x32xf32> to vector<2x8xf32>
    %4 = vector.shape_cast %3 : vector<2x8xf32> to vector<2x8x1xf32>
    %cst_8 = arith.constant 3.200000e+01 : f32
    %5 = vector.broadcast %cst_8 : f32 to vector<2x8x1xf32>
    %6 = arith.divf %4, %5 : vector<2x8x1xf32>
    %7 = vector.broadcast %6 : vector<2x8x1xf32> to vector<2x8x32xf32>
    %8 = arith.subf %2, %7 : vector<2x8x32xf32>
    %9 = arith.mulf %8, %8 : vector<2x8x32xf32>
    %cst_9 = arith.constant dense<0.000000e+00> : vector<2x8xf32>
    %10 = vector.multi_reduction <add>, %9, %cst_9 [2] : vector<2x8x32xf32> to vector<2x8xf32>
    %11 = vector.shape_cast %10 : vector<2x8xf32> to vector<2x8x1xf32>
    %cst_10 = arith.constant 3.200000e+01 : f32
    %12 = vector.broadcast %cst_10 : f32 to vector<2x8x1xf32>
    %13 = arith.divf %11, %12 : vector<2x8x1xf32>
    %14 = vector.broadcast %6 : vector<2x8x1xf32> to vector<2x8x32xf32>
    %15 = arith.subf %2, %14 : vector<2x8x32xf32>
    %cst_11 = arith.constant 9.99999974E-6 : f32
    %16 = vector.broadcast %cst_11 : f32 to vector<2x8x1xf32>
    %17 = arith.addf %13, %16 : vector<2x8x1xf32>
    %18 = math.rsqrt %17 : vector<2x8x1xf32>
    %19 = vector.broadcast %18 : vector<2x8x1xf32> to vector<2x8x32xf32>
    %20 = arith.mulf %15, %19 : vector<2x8x32xf32>
    %21 = vector.broadcast %0 : vector<1x1x32xf32> to vector<2x8x32xf32>
    %22 = arith.mulf %20, %21 : vector<2x8x32xf32>
    %23 = vector.broadcast %1 : vector<1x1x32xf32> to vector<2x8x32xf32>
    %24 = arith.addf %22, %23 : vector<2x8x32xf32>
    %c0_12 = arith.constant 0 : index
    %c0_13 = arith.constant 0 : index
    %c0_14 = arith.constant 0 : index
    %25 = vector.load %arg4[%c0_12, %c0_13, %c0_14] : memref<2x15x32xf32, #tpu.memory_space<vmem>>, vector<2x8x32xf32>
    tpu.vector_store %arg4[%c0_12, %c0_13, %c0_14], %24 {strides = array<i32>} : memref<2x15x32xf32, #tpu.memory_space<vmem>>, vector<2x8x32xf32>,
    %c0_15 = arith.constant 0 : index
    %c0_16 = arith.constant 0 : index
    %c0_17 = arith.constant 0 : index
    %26 = tpu.strided_load %arg1[%c0_15, %c0_16, %c0_17] {strides = array<i32: 1, 2, 1>} : memref<2x8x32xf32, #tpu.memory_space<vmem>>, vector<2x4x32xf32>
    %c0_18 = arith.constant 0 : index
    %c1 = arith.constant 1 : index
    %c0_19 = arith.constant 0 : index
    %27 = tpu.strided_load %arg1[%c0_18, %c1, %c0_19] {strides = array<i32: 1, 2, 1>} : memref<2x8x32xf32, #tpu.memory_space<vmem>>, vector<2x4x32xf32>
    %28 = arith.addf %26, %27 : vector<2x4x32xf32>
    %cst_20 = arith.constant 5.000000e-01 : f32
    %29 = vector.broadcast %cst_20 : f32 to vector<2x4x32xf32>
    %30 = arith.mulf %28, %29 : vector<2x4x32xf32>
    %cst_21 = arith.constant dense<0.000000e+00> : vector<2x4xf32>
    %31 = vector.multi_reduction <add>, %30, %cst_21 [2] : vector<2x4x32xf32> to vector<2x4xf32>
    %32 = vector.shape_cast %31 : vector<2x4xf32> to vector<2x4x1xf32>
    %cst_22 = arith.constant 3.200000e+01 : f32
    %33 = vector.broadcast %cst_22 : f32 to vector<2x4x1xf32>
    %34 = arith.divf %32, %33 : vector<2x4x1xf32>
    %35 = vector.broadcast %34 : vector<2x4x1xf32> to vector<2x4x32xf32>
    %36 = arith.subf %30, %35 : vector<2x4x32xf32>
    %37 = arith.mulf %36, %36 : vector<2x4x32xf32>
    %cst_23 = arith.constant dense<0.000000e+00> : vector<2x4xf32>
    %38 = vector.multi_reduction <add>, %37, %cst_23 [2] : vector<2x4x32xf32> to vector<2x4xf32>
    %39 = vector.shape_cast %38 : vector<2x4xf32> to vector<2x4x1xf32>
    %cst_24 = arith.constant 3.200000e+01 : f32
    %40 = vector.broadcast %cst_24 : f32 to vector<2x4x1xf32>
    %41 = arith.divf %39, %40 : vector<2x4x1xf32>
    %42 = vector.broadcast %34 : vector<2x4x1xf32> to vector<2x4x32xf32>
    %43 = arith.subf %30, %42 : vector<2x4x32xf32>
    %cst_25 = arith.constant 9.99999974E-6 : f32
    %44 = vector.broadcast %cst_25 : f32 to vector<2x4x1xf32>
    %45 = arith.addf %41, %44 : vector<2x4x1xf32>
    %46 = math.rsqrt %45 : vector<2x4x1xf32>
    %47 = vector.broadcast %46 : vector<2x4x1xf32> to vector<2x4x32xf32>
    %48 = arith.mulf %43, %47 : vector<2x4x32xf32>
    %49 = vector.broadcast %0 : vector<1x1x32xf32> to vector<2x4x32xf32>
    %50 = arith.mulf %48, %49 : vector<2x4x32xf32>
    %51 = vector.broadcast %1 : vector<1x1x32xf32> to vector<2x4x32xf32>
    %52 = arith.addf %50, %51 : vector<2x4x32xf32>
    %c0_26 = arith.constant 0 : index
    %c8 = arith.constant 8 : index
    %c0_27 = arith.constant 0 : index
    %53 = vector.load %arg4[%c0_26, %c8, %c0_27] : memref<2x15x32xf32, #tpu.memory_space<vmem>>, vector<2x4x32xf32>
    tpu.vector_store %arg4[%c0_26, %c8, %c0_27], %52 {strides = array<i32>} : memref<2x15x32xf32, #tpu.memory_space<vmem>>, vector<2x4x32xf32>,
    %c0_28 = arith.constant 0 : index
    %c0_29 = arith.constant 0 : index
    %c0_30 = arith.constant 0 : index
    %54 = tpu.strided_load %arg1[%c0_28, %c0_29, %c0_30] {strides = array<i32: 1, 4, 1>} : memref<2x8x32xf32, #tpu.memory_space<vmem>>, vector<2x2x32xf32>
    %c0_31 = arith.constant 0 : index
    %c1_32 = arith.constant 1 : index
    %c0_33 = arith.constant 0 : index
    %55 = tpu.strided_load %arg1[%c0_31, %c1_32, %c0_33] {strides = array<i32: 1, 4, 1>} : memref<2x8x32xf32, #tpu.memory_space<vmem>>, vector<2x2x32xf32>
    %56 = arith.addf %54, %55 : vector<2x2x32xf32>
    %c0_34 = arith.constant 0 : index
    %c2 = arith.constant 2 : index
    %c0_35 = arith.constant 0 : index
    %57 = tpu.strided_load %arg1[%c0_34, %c2, %c0_35] {strides = array<i32: 1, 4, 1>} : memref<2x8x32xf32, #tpu.memory_space<vmem>>, vector<2x2x32xf32>
    %58 = arith.addf %56, %57 : vector<2x2x32xf32>
    %c0_36 = arith.constant 0 : index
    %c3 = arith.constant 3 : index
    %c0_37 = arith.constant 0 : index
    %59 = tpu.strided_load %arg1[%c0_36, %c3, %c0_37] {strides = array<i32: 1, 4, 1>} : memref<2x8x32xf32, #tpu.memory_space<vmem>>, vector<2x2x32xf32>
    %60 = arith.addf %58, %59 : vector<2x2x32xf32>
    %cst_38 = arith.constant 2.500000e-01 : f32
    %61 = vector.broadcast %cst_38 : f32 to vector<2x2x32xf32>
    %62 = arith.mulf %60, %61 : vector<2x2x32xf32>
    %cst_39 = arith.constant dense<0.000000e+00> : vector<2x2xf32>
    %63 = vector.multi_reduction <add>, %62, %cst_39 [2] : vector<2x2x32xf32> to vector<2x2xf32>
    %64 = vector.shape_cast %63 : vector<2x2xf32> to vector<2x2x1xf32>
    %cst_40 = arith.constant 3.200000e+01 : f32
    %65 = vector.broadcast %cst_40 : f32 to vector<2x2x1xf32>
    %66 = arith.divf %64, %65 : vector<2x2x1xf32>
    %67 = vector.broadcast %66 : vector<2x2x1xf32> to vector<2x2x32xf32>
    %68 = arith.subf %62, %67 : vector<2x2x32xf32>
    %69 = arith.mulf %68, %68 : vector<2x2x32xf32>
    %cst_41 = arith.constant dense<0.000000e+00> : vector<2x2xf32>
    %70 = vector.multi_reduction <add>, %69, %cst_41 [2] : vector<2x2x32xf32> to vector<2x2xf32>
    %71 = vector.shape_cast %70 : vector<2x2xf32> to vector<2x2x1xf32>
    %cst_42 = arith.constant 3.200000e+01 : f32
    %72 = vector.broadcast %cst_42 : f32 to vector<2x2x1xf32>
    %73 = arith.divf %71, %72 : vector<2x2x1xf32>
    %74 = vector.broadcast %66 : vector<2x2x1xf32> to vector<2x2x32xf32>
    %75 = arith.subf %62, %74 : vector<2x2x32xf32>
    %cst_43 = arith.constant 9.99999974E-6 : f32
    %76 = vector.broadcast %cst_43 : f32 to vector<2x2x1xf32>
    %77 = arith.addf %73, %76 : vector<2x2x1xf32>
    %78 = math.rsqrt %77 : vector<2x2x1xf32>
    %79 = vector.broadcast %78 : vector<2x2x1xf32> to vector<2x2x32xf32>
    %80 = arith.mulf %75, %79 : vector<2x2x32xf32>
    %81 = vector.broadcast %0 : vector<1x1x32xf32> to vector<2x2x32xf32>
    %82 = arith.mulf %80, %81 : vector<2x2x32xf32>
    %83 = vector.broadcast %1 : vector<1x1x32xf32> to vector<2x2x32xf32>
    %84 = arith.addf %82, %83 : vector<2x2x32xf32>
    %c0_44 = arith.constant 0 : index
    %c12 = arith.constant 12 : index
    %c0_45 = arith.constant 0 : index
    %85 = vector.load %arg4[%c0_44, %c12, %c0_45] : memref<2x15x32xf32, #tpu.memory_space<vmem>>, vector<2x2x32xf32>
    tpu.vector_store %arg4[%c0_44, %c12, %c0_45], %84 {strides = array<i32>} : memref<2x15x32xf32, #tpu.memory_space<vmem>>, vector<2x2x32xf32>,
    %c0_46 = arith.constant 0 : index
    %c0_47 = arith.constant 0 : index
    %c0_48 = arith.constant 0 : index
    %86 = tpu.strided_load %arg1[%c0_46, %c0_47, %c0_48] {strides = array<i32: 1, 8, 1>} : memref<2x8x32xf32, #tpu.memory_space<vmem>>, vector<2x1x32xf32>
    %c0_49 = arith.constant 0 : index
    %c1_50 = arith.constant 1 : index
    %c0_51 = arith.constant 0 : index
    %87 = tpu.strided_load %arg1[%c0_49, %c1_50, %c0_51] {strides = array<i32: 1, 8, 1>} : memref<2x8x32xf32, #tpu.memory_space<vmem>>, vector<2x1x32xf32>
    %88 = arith.addf %86, %87 : vector<2x1x32xf32>
    %c0_52 = arith.constant 0 : index
    %c2_53 = arith.constant 2 : index
    %c0_54 = arith.constant 0 : index
    %89 = tpu.strided_load %arg1[%c0_52, %c2_53, %c0_54] {strides = array<i32: 1, 8, 1>} : memref<2x8x32xf32, #tpu.memory_space<vmem>>, vector<2x1x32xf32>
    %90 = arith.addf %88, %89 : vector<2x1x32xf32>
    %c0_55 = arith.constant 0 : index
    %c3_56 = arith.constant 3 : index
    %c0_57 = arith.constant 0 : index
    %91 = tpu.strided_load %arg1[%c0_55, %c3_56, %c0_57] {strides = array<i32: 1, 8, 1>} : memref<2x8x32xf32, #tpu.memory_space<vmem>>, vector<2x1x32xf32>
    %92 = arith.addf %90, %91 : vector<2x1x32xf32>
    %c0_58 = arith.constant 0 : index
    %c4 = arith.constant 4 : index
    %c0_59 = arith.constant 0 : index
    %93 = tpu.strided_load %arg1[%c0_58, %c4, %c0_59] {strides = array<i32: 1, 8, 1>} : memref<2x8x32xf32, #tpu.memory_space<vmem>>, vector<2x1x32xf32>
    %94 = arith.addf %92, %93 : vector<2x1x32xf32>
    %c0_60 = arith.constant 0 : index
    %c5 = arith.constant 5 : index
    %c0_61 = arith.constant 0 : index
    %95 = tpu.strided_load %arg1[%c0_60, %c5, %c0_61] {strides = array<i32: 1, 8, 1>} : memref<2x8x32xf32, #tpu.memory_space<vmem>>, vector<2x1x32xf32>
    %96 = arith.addf %94, %95 : vector<2x1x32xf32>
    %c0_62 = arith.constant 0 : index
    %c6 = arith.constant 6 : index
    %c0_63 = arith.constant 0 : index
    %97 = tpu.strided_load %arg1[%c0_62, %c6, %c0_63] {strides = array<i32: 1, 8, 1>} : memref<2x8x32xf32, #tpu.memory_space<vmem>>, vector<2x1x32xf32>
    %98 = arith.addf %96, %97 : vector<2x1x32xf32>
    %c0_64 = arith.constant 0 : index
    %c7 = arith.constant 7 : index
    %c0_65 = arith.constant 0 : index
    %99 = tpu.strided_load %arg1[%c0_64, %c7, %c0_65] {strides = array<i32: 1, 8, 1>} : memref<2x8x32xf32, #tpu.memory_space<vmem>>, vector<2x1x32xf32>
    %100 = arith.addf %98, %99 : vector<2x1x32xf32>
    %cst_66 = arith.constant 1.250000e-01 : f32
    %101 = vector.broadcast %cst_66 : f32 to vector<2x1x32xf32>
    %102 = arith.mulf %100, %101 : vector<2x1x32xf32>
    %cst_67 = arith.constant dense<0.000000e+00> : vector<2x1xf32>
    %103 = vector.multi_reduction <add>, %102, %cst_67 [2] : vector<2x1x32xf32> to vector<2x1xf32>
    %104 = vector.shape_cast %103 : vector<2x1xf32> to vector<2x1x1xf32>
    %cst_68 = arith.constant 3.200000e+01 : f32
    %105 = vector.broadcast %cst_68 : f32 to vector<2x1x1xf32>
    %106 = arith.divf %104, %105 : vector<2x1x1xf32>
    %107 = vector.broadcast %106 : vector<2x1x1xf32> to vector<2x1x32xf32>
    %108 = arith.subf %102, %107 : vector<2x1x32xf32>
    %109 = arith.mulf %108, %108 : vector<2x1x32xf32>
    %cst_69 = arith.constant dense<0.000000e+00> : vector<2x1xf32>
    %110 = vector.multi_reduction <add>, %109, %cst_69 [2] : vector<2x1x32xf32> to vector<2x1xf32>
    %111 = vector.shape_cast %110 : vector<2x1xf32> to vector<2x1x1xf32>
    %cst_70 = arith.constant 3.200000e+01 : f32
    %112 = vector.broadcast %cst_70 : f32 to vector<2x1x1xf32>
    %113 = arith.divf %111, %112 : vector<2x1x1xf32>
    %114 = vector.broadcast %106 : vector<2x1x1xf32> to vector<2x1x32xf32>
    %115 = arith.subf %102, %114 : vector<2x1x32xf32>
    %cst_71 = arith.constant 9.99999974E-6 : f32
    %116 = vector.broadcast %cst_71 : f32 to vector<2x1x1xf32>
    %117 = arith.addf %113, %116 : vector<2x1x1xf32>
    %118 = math.rsqrt %117 : vector<2x1x1xf32>
    %119 = vector.broadcast %118 : vector<2x1x1xf32> to vector<2x1x32xf32>
    %120 = arith.mulf %115, %119 : vector<2x1x32xf32>
    %121 = vector.broadcast %0 : vector<1x1x32xf32> to vector<2x1x32xf32>
    %122 = arith.mulf %120, %121 : vector<2x1x32xf32>
    %123 = vector.broadcast %1 : vector<1x1x32xf32> to vector<2x1x32xf32>
    %124 = arith.addf %122, %123 : vector<2x1x32xf32>
    %c0_72 = arith.constant 0 : index
    %c14 = arith.constant 14 : index
    %c0_73 = arith.constant 0 : index
    %125 = vector.load %arg4[%c0_72, %c14, %c0_73] : memref<2x15x32xf32, #tpu.memory_space<vmem>>, vector<2x1x32xf32>
    tpu.vector_store %arg4[%c0_72, %c14, %c0_73], %124 {strides = array<i32>} : memref<2x15x32xf32, #tpu.memory_space<vmem>>, vector<2x1x32xf32>,
    return
  }
  func.func @transform_0(%arg0: i32) -> (i32, i32, i32) {
    %c0_i32 = arith.constant 0 : i32
    %c0_i32_0 = arith.constant 0 : i32
    %c0_i32_1 = arith.constant 0 : i32
    return %arg0, %c0_i32, %c0_i32_0 : i32, i32, i32
  }
  func.func @transform_1(%arg0: i32) -> (i32, i32, i32) {
    %c0_i32 = arith.constant 0 : i32
    %c0_i32_0 = arith.constant 0 : i32
    %c0_i32_1 = arith.constant 0 : i32
    %c0_i32_2 = arith.constant 0 : i32
    return %c0_i32, %c0_i32_0, %c0_i32_1 : i32, i32, i32
  }
  func.func @transform_2(%arg0: i32) -> (i32, i32, i32) {
    %c0_i32 = arith.constant 0 : i32
    %c0_i32_0 = arith.constant 0 : i32
    %c0_i32_1 = arith.constant 0 : i32
    %c0_i32_2 = arith.constant 0 : i32
    return %c0_i32, %c0_i32_0, %c0_i32_1 : i32, i32, i32
  }
  func.func @transform_3(%arg0: i32) -> (i32, i32, i32) {
    %c0_i32 = arith.constant 0 : i32
    %c0_i32_0 = arith.constant 0 : i32
    %c0_i32_1 = arith.constant 0 : i32
    return %arg0, %c0_i32, %c0_i32_0 : i32, i32, i32
  }
}

</mosaic_0001>

<bundles_post_ra>
// kernel: tpu_custom_call.1
= control target key start
LH: loop header
LB: loop body
LE: loop exit
PB: predicated region body
PF: predicated region fallthrough
CT: control target
= control target key end

     0   :  { %8 = vsyncpa [#allocation3], 0  ;;  %s620_s0 = inlined_call_operand.hbm [shape: f32[2,8,32], index: 0, kind: input, shape index: {}]   ;;  %s621_s1 = inlined_call_operand.hbm [shape: f32[1,1,32], index: 1, kind: input, shape index: {}]   ;;  %s622_s2 = inlined_call_operand.vmem [shape: f32[1,1,32], index: 2, kind: input, shape index: {}]   ;;  %s623_s3 = inlined_call_operand.vmem [shape: f32[2,15,32], index: 3, kind: output, shape index: {}]  }
   0x1   :  { %s14_s14 = sshll.u32 %s620_s0, 4  ;;  %s15_s14 = int_to_ptr.hbm [resolvable:$true] %s14_s14 }
   0x2   :  { %9 = vsyncpa [#allocation5], 0  ;;  %s419_s15 = smov [#allocation2]   ;;  %s28_s19 = sshll.u32 %s621_s1, 4  ;;  %s29_s19 = int_to_ptr.hbm [resolvable:$true] %s28_s19 }
   0x3   :  { %s16_s16 = sshll.u32 %s419_s15, 4  ;;  %s420_s20 = smov 128   ;;  %s17_s16 = int_to_ptr.vmem [resolvable:$true] %s16_s16 }
   0x4   :  { %s421_s21 = smov 8   ;;  %s422_s22 = smov [#allocation4]  }
   0x5   :  { %22 = dma.hbm_to_vmem [thread:$0]  %s15_s14, 256, %s17_s16, [#allocation3], %s420_s20, %s420_s20, %s421_s21  }
   0x6   :  { %s30_s23 = sshll.u32 %s422_s22, 4  ;;  %s31_s23 = int_to_ptr.vmem [resolvable:$true] %s30_s23 }
   0x7   :  { %33 = dma.hbm_to_vmem [thread:$0]  %s29_s19, 16, %s31_s23, [#allocation5]  }
   0x8   :  { %415 = dma.done.wait [#allocation3], 256  }
   0x9   :  { %416 = vsyncadd [#allocation3], 4294967040 }
   0xa   :  { %417 = dma.done.wait [#allocation5], 16  }
   0xb   :  { %418 = vsyncadd [#allocation5], 4294967280  ;;  %vm48_vm0 = vcmask 261120   ;;  %v450_v0 = vld [vmem:[#allocation2] sm:$0xff]  ;;  %vm123_vm1 = vcmask 257024   ;;  %v454_v4 = vld [vmem:[#allocation2 + $0x8] sm:$0xff] }
   0xc   :  { %v112_v1 = vld [vmem:[#allocation2] ss:$2 sm:$0xf]  ;;  %v49_v2 = vsel %vm48_vm0, %v450_v0, 0.0  ;;  %v52_v17 = vsel %vm48_vm0, %v454_v4, 0.0  ;;  %vm194_vm2 = vcmask 254976  }
   0xd   :  { %v116_v3 = vld [vmem:[#allocation2 + $0x1] ss:$2 sm:$0xf]  ;;  %50 = vadd.xlane.f32.xlu0 %v49_v2  ;;  %v174_v6 = vld [vmem:[#allocation2] ss:$4 sm:$0x3] }
   0xe   :  { %v119_v5 = vadd.f32 %v116_v3, %v112_v1  ;;  %v176_v7 = vld [vmem:[#allocation2 + $0x1] ss:$4 sm:$0x3]  ;;  %v181_v9 = vld [vmem:[#allocation2 + $0x2] ss:$4 sm:$0x3] }
   0xf   :  { %v178_v8 = vadd.f32 %v176_v7, %v174_v6  ;;  %v187_v10 = vld [vmem:[#allocation2 + $0x3] ss:$4 sm:$0x3]  ;;  %v114_v12 = vld [vmem:[#allocation2 + $0x8] ss:$2 sm:$0xf] }
  0x10   :  { %v456_v11 = vmul.f32 0.5, %v119_v5  ;;  %v118_v14 = vld [vmem:[#allocation2 + $0x9] ss:$2 sm:$0xf]  ;;  %vm285_vm3 = vcmask 253952   ;;  %v423_v3 = vmov 32.0  }
  0x11   :  { %v184_v13 = vadd.f32 %v181_v9, %v178_v8  ;;  %v175_v15 = vld [vmem:[#allocation2 + $0x8] ss:$4 sm:$0x3]  ;;  %v120_v18 = vadd.f32 %v118_v14, %v114_v12  ;;  %v177_v19 = vld [vmem:[#allocation2 + $0x9] ss:$4 sm:$0x3]  ;;  %349 = vrcp.f32 %v423_v3 }
  0x12   :  { %v124_v16 = vsel %vm123_vm1, %v456_v11, 0.0  ;;  %v179_v21 = vadd.f32 %v177_v19, %v175_v15  ;;  %v183_v22 = vld [vmem:[#allocation2 + $0xa] ss:$4 sm:$0x3] }
  0x13   :  { %125 = vadd.xlane.f32.xlu1 %v124_v16  ;;  %v190_v20 = vadd.f32 %v187_v10, %v184_v13  ;;  %v189_v23 = vld [vmem:[#allocation2 + $0xb] ss:$4 sm:$0x3]  ;;  %v462_v24 = vmul.f32 0.5, %v120_v18 }
  0x14   :  { %v245_v25 = vld [vmem:[#allocation2] ss:$8 sm:$0x1]  ;;  %v185_v27 = vadd.f32 %v183_v22, %v179_v21  ;;  %v247_v28 = vld [vmem:[#allocation2 + $0x1] ss:$8 sm:$0x1] }
  0x15   :  { %v464_v26 = vmul.f32 0.25, %v190_v20  ;;  %53 = vadd.xlane.f32.xlu0 %v52_v17  ;;  %v249_v29 = vadd.f32 %v247_v28, %v245_v25  ;;  %v251_v30 = vld [vmem:[#allocation2 + $0x2] ss:$8 sm:$0x1]  ;;  %v127_v34 = vsel %vm123_vm1, %v462_v24, 0.0 }
  0x16   :  { %v191_v32 = vadd.f32 %v189_v23, %v185_v27  ;;  %v255_v33 = vld [vmem:[#allocation2 + $0x3] ss:$8 sm:$0x1]  ;;  %v260_v37 = vld [vmem:[#allocation2 + $0x4] ss:$8 sm:$0x1] }
  0x17   :  { %v195_v31 = vsel %vm194_vm2, %v464_v26, 0.0  ;;  %v253_v35 = vadd.f32 %v251_v30, %v249_v29  ;;  %v246_v39 = vld [vmem:[#allocation2 + $0x8] ss:$8 sm:$0x1]  ;;  %v350_v5 = vpop.eup %349 }
  0x18   :  { %196 = vadd.xlane.f32.xlu2 %v195_v31  ;;  %v470_v36 = vmul.f32 0.25, %v191_v32  ;;  %v266_v40 = vld [vmem:[#allocation2 + $0x5] ss:$8 sm:$0x1]  ;;  %v56_v6 = vmul.f32 32.0, %v350_v5  ;;  %vm60_vm4 = vweird.f32 %v350_v5 }
  0x19   :  { %v257_v38 = vadd.f32 %v255_v33, %v253_v35  ;;  %v248_v41 = vld [vmem:[#allocation2 + $0x9] ss:$8 sm:$0x1]  ;;  %v272_v43 = vld [vmem:[#allocation2 + $0x6] ss:$8 sm:$0x1] }
  0x1a   :  { %v250_v44 = vadd.f32 %v248_v41, %v246_v39  ;;  %v252_v45 = vld [vmem:[#allocation2 + $0xa] ss:$8 sm:$0x1]  ;;  %v198_v46 = vsel %vm194_vm2, %v470_v36, 0.0  ;;  %v57_v7 = vsub.f32 1.0, %v56_v6 }
  0x1b   :  { %128 = vadd.xlane.f32.xlu1 %v127_v34  ;;  %v263_v42 = vadd.f32 %v260_v37, %v257_v38  ;;  %v256_v47 = vld [vmem:[#allocation2 + $0xb] ss:$8 sm:$0x1]  ;;  %v278_v50 = vld [vmem:[#allocation2 + $0x7] ss:$8 sm:$0x1] }
  0x1c   :  { %v254_v49 = vadd.f32 %v252_v45, %v250_v44  ;;  %v262_v51 = vld [vmem:[#allocation2 + $0xc] ss:$8 sm:$0x1]  ;;  %v268_v54 = vld [vmem:[#allocation2 + $0xd] ss:$8 sm:$0x1]  ;;  %v58_v8 = vmul.f32 %v350_v5, %v57_v7 }
  0x1d   :  { %v269_v48 = vadd.f32 %v266_v40, %v263_v42  ;;  %v274_v57 = vld [vmem:[#allocation2 + $0xe] ss:$8 sm:$0x1]  ;;  %v280_v60 = vld [vmem:[#allocation2 + $0xf] ss:$8 sm:$0x1] }
  0x1e   :  { %v258_v53 = vadd.f32 %v256_v47, %v254_v49  ;;  %v59_v9 = vadd.f32 %v350_v5, %v58_v8 }
  0x1f   :  { %v275_v52 = vadd.f32 %v272_v43, %v269_v48 }
  0x20   :  { %199 = vadd.xlane.f32.xlu2 %v198_v46  ;;  %v264_v56 = vadd.f32 %v262_v51, %v258_v53  ;;  %v476_v10 = vsel %vm60_vm4, %v350_v5, %v59_v9 }
  0x21   :  { %v281_v55 = vadd.f32 %v278_v50, %v275_v52 }
  0x22   :  { %v270_v59 = vadd.f32 %v268_v54, %v264_v56 }
  0x23   :  { %v283_v58 = vmul.f32 0.125, %v281_v55 }
  0x24   :  { %v276_v62 = vadd.f32 %v274_v57, %v270_v59 }
  0x25   :  { %v286_v61 = vsel %vm285_vm3, %v283_v58, 0.0 }
  0x26   :  { %287 = vadd.xlane.f32.xlu0 %v286_v61  ;;  %v282_v63 = vadd.f32 %v280_v60, %v276_v62 }
  0x28   :  { %v284_v1 = vmul.f32 0.125, %v282_v63 }
  0x2a   :  { %v289_v2 = vsel %vm285_vm3, %v284_v1, 0.0 }
  0x2b   :  { %290 = vadd.xlane.f32.xlu1 %v289_v2 }
  0x80   :  { %v51_v12 = vpop.xlane.xlu0 %50 }
  0x81   :  { %v62_v13 = vmul.f32 %v476_v10, %v51_v12 }
  0x83   :  { %v480_v14 = vsub.f32 %v450_v0, %v62_v13 }
  0x85   :  { %v66_v16 = vmul.f32 %v480_v14, %v480_v14 }
  0x86   :  { %v126_v15 = vpop.xlane.xlu1 %125 }
  0x87   :  { %v130_v17 = vmul.f32 %v126_v15, %v476_v10  ;;  %v68_v18 = vsel %vm48_vm0, %v66_v16, 0.0 }
  0x88   :  { %69 = vadd.xlane.f32.xlu2 %v68_v18  ;;  %v54_v20 = vpop.xlane.xlu0 %53  ;;  %v543_v18 = vld [vmem:[#allocation4] ss:$0 sm:$0xff] }
  0x89   :  { %v487_v19 = vsub.f32 %v456_v11, %v130_v17  ;;  %v63_v21 = vmul.f32 %v476_v10, %v54_v20 }
  0x8b   :  { %v197_v22 = vpop.xlane.xlu2 %196  ;;  %v134_v0 = vmul.f32 %v487_v19, %v487_v19  ;;  %v494_v25 = vsub.f32 %v454_v4, %v63_v21 }
  0x8c   :  { %v201_v23 = vmul.f32 %v197_v22, %v476_v10 }
  0x8d   :  { %v136_v27 = vsel %vm123_vm1, %v134_v0, 0.0  ;;  %v67_v29 = vmul.f32 %v494_v25, %v494_v25 }
  0x8e   :  { %v498_v28 = vsub.f32 %v464_v26, %v201_v23  ;;  %137 = vadd.xlane.f32.xlu1 %v136_v27  ;;  %v129_v11 = vpop.xlane.xlu1 %128  ;;  %v552_v27 = vld [vmem:[%s622_s2] ss:$0 sm:$0xff] }
  0x8f   :  { %v131_v30 = vmul.f32 %v129_v11, %v476_v10  ;;  %v71_v31 = vsel %vm48_vm0, %v67_v29, 0.0 }
  0x90   :  { %72 = vadd.xlane.f32.xlu0 %v71_v31  ;;  %v205_v4 = vmul.f32 %v498_v28, %v498_v28 }
  0x91   :  { %v505_v32 = vsub.f32 %v462_v24, %v131_v30 }
  0x92   :  { %v207_v38 = vsel %vm194_vm2, %v205_v4, 0.0 }
  0x93   :  { %v200_v33 = vpop.xlane.xlu2 %199  ;;  %v135_v26 = vmul.f32 %v505_v32, %v505_v32 }
  0x94   :  { %v202_v34 = vmul.f32 %v200_v33, %v476_v10 }
  0x95   :  { %v139_v35 = vsel %vm123_vm1, %v135_v26, 0.0 }
  0x96   :  { %v514_v37 = vsub.f32 %v470_v36, %v202_v34  ;;  %140 = vadd.xlane.f32.xlu2 %v139_v35 }
  0x98   :  { %v206_v24 = vmul.f32 %v514_v37, %v514_v37  ;;  %208 = vadd.xlane.f32.xlu0 %v207_v38 }
  0x99   :  { %v288_v39 = vpop.xlane.xlu0 %287 }
  0x9a   :  { %v210_v40 = vsel %vm194_vm2, %v206_v24, 0.0  ;;  %v292_v41 = vmul.f32 %v288_v39, %v476_v10 }
  0x9b   :  { %211 = vadd.xlane.f32.xlu1 %v210_v40 }
  0x9c   :  { %v521_v42 = vsub.f32 %v283_v58, %v292_v41 }
  0x9e   :  { %v296_v43 = vmul.f32 %v521_v42, %v521_v42  ;;  %v291_v36 = vpop.xlane.xlu1 %290 }
  0x9f   :  { %v293_v44 = vmul.f32 %v291_v36, %v476_v10 }
  0xa0   :  { %v298_v45 = vsel %vm285_vm3, %v296_v43, 0.0 }
  0xa1   :  { %299 = vadd.xlane.f32.xlu2 %v298_v45  ;;  %v527_v46 = vsub.f32 %v284_v1, %v293_v44 }
  0xa3   :  { %v297_v47 = vmul.f32 %v527_v46, %v527_v46 }
  0xa5   :  { %v301_v48 = vsel %vm285_vm3, %v297_v47, 0.0 }
  0xa6   :  { %302 = vadd.xlane.f32.xlu0 %v301_v48 }
  0xfb   :  { %v70_v49 = vpop.xlane.xlu2 %69 }
  0xfc   :  { %v74_v50 = vmul.f32 %v70_v49, %v476_v10 }
  0xfe   :  { %v76_v51 = vadd.f32 1e-05, %v74_v50 }
 0x100   :  { %351 = vrsqrt.f32 %v76_v51  ;;  %vm84_vm6 = vweird.f32 %v76_v51 }
 0x101   :  { %v138_v52 = vpop.xlane.xlu1 %137 }
 0x102   :  { %v142_v53 = vmul.f32 %v138_v52, %v476_v10 }
 0x103   :  { %v73_v55 = vpop.xlane.xlu0 %72 }
 0x104   :  { %v144_v54 = vadd.f32 1e-05, %v142_v53  ;;  %v75_v56 = vmul.f32 %v73_v55, %v476_v10 }
 0x106   :  { %353 = vrsqrt.f32 %v144_v54  ;;  %v352_v57 = vpop.eup %351  ;;  %v77_v58 = vadd.f32 1e-05, %v75_v56  ;;  %vm152_vm9 = vweird.f32 %v144_v54 }
 0x107   :  { %v79_v59 = vmul.f32 %v352_v57, %v76_v51  ;;  %vm85_vm5 = vweird.f32 %v352_v57 }
 0x108   :  { %355 = vrsqrt.f32 %v77_v58  ;;  %vm86_vm7 = vmor %vm84_vm6, %vm85_vm5  ;;  %vm94_vm12 = vweird.f32 %v77_v58 }
 0x109   :  { %v141_v60 = vpop.xlane.xlu2 %140  ;;  %v80_v61 = vmul.f32 %v352_v57, %v79_v59 }
 0x10a   :  { %v143_v62 = vmul.f32 %v141_v60, %v476_v10 }
 0x10b   :  { %v81_v1 = vmul.f32 0.5, %v80_v61  ;;  %v209_v3 = vpop.xlane.xlu0 %208 }
 0x10c   :  { %v354_v63 = vpop.eup %353  ;;  %v536_v2 = vadd.f32 1e-05, %v143_v62  ;;  %v213_v6 = vmul.f32 %v209_v3, %v476_v10 }
 0x10d   :  { %v147_v5 = vmul.f32 %v354_v63, %v144_v54  ;;  %v82_v7 = vsub.f32 1.5, %v81_v1  ;;  %vm153_vm8 = vweird.f32 %v354_v63 }
 0x10e   :  { %357 = vrsqrt.f32 %v536_v2  ;;  %v212_v8 = vpop.xlane.xlu1 %211  ;;  %v356_v9 = vpop.eup %355  ;;  %v541_v15 = vadd.f32 1e-05, %v213_v6  ;;  %vm154_vm10 = vmor %vm152_vm9, %vm153_vm8  ;;  %vm162_vm15 = vweird.f32 %v536_v2 }
 0x10f   :  { %v148_v12 = vmul.f32 %v354_v63, %v147_v5  ;;  %v214_v13 = vmul.f32 %v212_v8, %v476_v10  ;;  %v83_v16 = vmul.f32 %v352_v57, %v82_v7  ;;  %v89_v17 = vmul.f32 %v356_v9, %v77_v58 }
 0x110   :  { %359 = vrsqrt.f32 %v541_v15  ;;  %vm95_vm11 = vweird.f32 %v356_v9  ;;  %vm223_vm8 = vweird.f32 %v541_v15 }
 0x111   :  { %v149_v20 = vmul.f32 0.5, %v148_v12  ;;  %v545_v21 = vadd.f32 1e-05, %v214_v13  ;;  %v87_v22 = vsel %vm86_vm7, %v352_v57, %v83_v16  ;;  %v90_v0 = vmul.f32 %v356_v9, %v89_v17  ;;  %vm96_vm13 = vmor %vm94_vm12, %vm95_vm11 }
 0x112   :  { %v98_v23 = vmul.f32 %v87_v22, %v480_v14 }
 0x113   :  { %v150_v11 = vsub.f32 1.5, %v149_v20  ;;  %361 = vrsqrt.f32 %v545_v21  ;;  %v91_v30 = vmul.f32 0.5, %v90_v0  ;;  %vm233_vm5 = vweird.f32 %v545_v21 }
 0x114   :  { %v358_v29 = vpop.eup %357  ;;  %v103_v31 = vmul.f32 %v543_v18, %v98_v23  ;;  %v300_v26 = vpop.xlane.xlu2 %299 }
 0x115   :  { %v151_v4 = vmul.f32 %v354_v63, %v150_v11  ;;  %v157_v33 = vmul.f32 %v358_v29, %v536_v2  ;;  %v92_v14 = vsub.f32 1.5, %v91_v30  ;;  %v304_v34 = vmul.f32 %v300_v26, %v476_v10  ;;  %v44_v11 = vld [vmem:[#allocation4] sm:$0x1] }
 0x116   :  { %v360_v35 = vpop.eup %359  ;;  %v108_v38 = vadd.f32 %v552_v27, %v103_v31  ;;  %vm163_vm14 = vweird.f32 %v358_v29  ;;  %v45_v31 = vld [vmem:[%s622_s2] sm:$0x1] }
 0x117   :  { %v155_v24 = vsel %vm154_vm10, %v354_v63, %v151_v4  ;;  %v158_v39 = vmul.f32 %v358_v29, %v157_v33  ;;  %v93_v41 = vmul.f32 %v356_v9, %v92_v14  ;;  %v218_v43 = vmul.f32 %v360_v35, %v541_v15  ;;  %vm164_vm4 = vmor %vm162_vm15, %vm163_vm14 }
 0x118   :  { %v166_v40 = vmul.f32 %v155_v24, %v487_v19  ;;  %110 = vst.msk [vmem:[%s623_s3] sm:$0xff] %vm48_vm0, %v108_v38  ;;  %v306_v45 = vadd.f32 1e-05, %v304_v34  ;;  %vm224_vm6 = vweird.f32 %v360_v35 }
 0x119   :  { %v362_v36 = vpop.eup %361  ;;  %v159_v44 = vmul.f32 0.5, %v158_v39  ;;  %v97_v48 = vsel %vm96_vm13, %v356_v9, %v93_v41  ;;  %v219_v51 = vmul.f32 %v360_v35, %v218_v43  ;;  %v303_v52 = vpop.xlane.xlu0 %302  ;;  %vm225_vm9 = vmor %vm223_vm8, %vm224_vm6 }
 0x11a   :  { %v168_v47 = vmul.f32 %v543_v18, %v166_v40  ;;  %v228_v49 = vmul.f32 %v362_v36, %v545_v21  ;;  %v99_v19 = vmul.f32 %v97_v48, %v494_v25  ;;  %363 = vrsqrt.f32 %v306_v45 }
 0x11b   :  { %v160_v50 = vsub.f32 1.5, %v159_v44  ;;  %v305_v55 = vmul.f32 %v303_v52, %v476_v10  ;;  %v220_v58 = vmul.f32 0.5, %v219_v51  ;;  %vm234_vm7 = vweird.f32 %v362_v36 }
 0x11c   :  { %v170_v53 = vadd.f32 %v552_v27, %v168_v47  ;;  %v229_v54 = vmul.f32 %v362_v36, %v228_v49  ;;  %v104_v56 = vmul.f32 %v543_v18, %v99_v19  ;;  %vm235_vm10 = vmor %vm233_vm5, %vm234_vm7 }
 0x11d   :  { %v161_v57 = vmul.f32 %v358_v29, %v160_v50  ;;  %v307_v59 = vadd.f32 1e-05, %v305_v55  ;;  %v221_v61 = vsub.f32 1.5, %v220_v58 }
 0x11e   :  { %172 = vst.msk [vmem:[%s623_s3 + $0x8] sm:$0xf] %vm123_vm1, %v170_v53  ;;  %v230_v25 = vmul.f32 0.5, %v229_v54  ;;  %v109_v60 = vadd.f32 %v552_v27, %v104_v56 }
 0x11f   :  { %v165_v10 = vsel %vm164_vm4, %v358_v29, %v161_v57  ;;  %365 = vrsqrt.f32 %v307_v59  ;;  %v222_v2 = vmul.f32 %v360_v35, %v221_v61  ;;  %vm324_vm13 = vweird.f32 %v307_v59 }
 0x120   :  { %v167_v62 = vmul.f32 %v165_v10, %v505_v32  ;;  %v231_v63 = vsub.f32 1.5, %v230_v25  ;;  %v364_v1 = vpop.eup %363  ;;  %111 = vst.msk [vmem:[%s623_s3 + $0x10] sm:$0xff] %vm48_vm0, %v109_v60 }
 0x121   :  { %v309_v6 = vmul.f32 %v364_v1, %v306_v45  ;;  %v226_v32 = vsel %vm225_vm9, %v360_v35, %v222_v2  ;;  %vm315_vm0 = vweird.f32 %v364_v1 }
 0x122   :  { %v169_v3 = vmul.f32 %v543_v18, %v167_v62  ;;  %v232_v5 = vmul.f32 %v362_v36, %v231_v63  ;;  %v237_v9 = vmul.f32 %v226_v32, %v498_v28 }
 0x123   :  { %v310_v12 = vmul.f32 %v364_v1, %v309_v6 }
 0x124   :  { %v171_v7 = vadd.f32 %v552_v27, %v169_v3  ;;  %v236_v8 = vsel %vm235_vm10, %v362_v36, %v232_v5  ;;  %v239_v15 = vmul.f32 %v543_v18, %v237_v9 }
 0x125   :  { %v238_v13 = vmul.f32 %v236_v8, %v514_v37  ;;  %v366_v16 = vpop.eup %365  ;;  %v311_v17 = vmul.f32 0.5, %v310_v12 }
 0x126   :  { %173 = vst.msk [vmem:[%s623_s3 + $0x18] sm:$0xf] %vm123_vm1, %v171_v7  ;;  %v319_v21 = vmul.f32 %v366_v16, %v307_v59  ;;  %v241_v22 = vadd.f32 %v552_v27, %v239_v15  ;;  %vm314_vm1 = vweird.f32 %v306_v45  ;;  %vm325_vm12 = vweird.f32 %v366_v16 }
 0x127   :  { %v240_v20 = vmul.f32 %v543_v18, %v238_v13  ;;  %v312_v0 = vsub.f32 1.5, %v311_v17  ;;  %vm316_vm11 = vmor %vm314_vm1, %vm315_vm0 }
 0x128   :  { %v320_v23 = vmul.f32 %v366_v16, %v319_v21  ;;  %243 = vst.msk [vmem:[%s623_s3 + $0xc] sm:$0x3] %vm194_vm2, %v241_v22  ;;  %vm326_vm14 = vmor %vm324_vm13, %vm325_vm12 }
 0x129   :  { %v242_v28 = vadd.f32 %v552_v27, %v240_v20  ;;  %v313_v37 = vmul.f32 %v364_v1, %v312_v0 }
 0x12a   :  { %v321_v18 = vmul.f32 0.5, %v320_v23 }
 0x12b   :  { %244 = vst.msk [vmem:[%s623_s3 + $0x1c] sm:$0x3] %vm194_vm2, %v242_v28  ;;  %v317_v29 = vsel %vm316_vm11, %v364_v1, %v313_v37 }
 0x12c   :  { %v328_v30 = vmul.f32 %v317_v29, %v521_v42  ;;  %v322_v27 = vsub.f32 1.5, %v321_v18 }
 0x12e   :  { %v330_v4 = vmul.f32 %v328_v30, %v44_v11  ;;  %v323_v33 = vmul.f32 %v366_v16, %v322_v27 }
 0x130   :  { %v332_v26 = vadd.f32 %v330_v4, %v45_v31  ;;  %v327_v14 = vsel %vm326_vm14, %v366_v16, %v323_v33 }
 0x131   :  { %v329_v34 = vmul.f32 %v327_v14, %v527_v46 }
 0x132   :  { %334 = vst.msk [vmem:[%s623_s3 + $0xe] sm:$0x1] %vm285_vm3, %v332_v26 }
 0x133   :  { %v331_v42 = vmul.f32 %v329_v34, %v44_v11 }
 0x135   :  { %v333_v35 = vadd.f32 %v331_v42, %v45_v31 }
 0x137   :  { %335 = vst.msk [vmem:[%s623_s3 + $0x1e] sm:$0x1] %vm285_vm3, %v333_v35 }
 0x138   :  { %340 = vsyncpa [#allocation3], 1 }
 0x139   :  { %341 = vsyncpa [#allocation5], 1 }

</bundles_post_ra>
